<compile_context>
chip_gen: v7x
topology: tpu7x:2x2x1
jax: 0.10.0
libtpu: 0.0.40
codegen_flags: <defaults>
</compile_context>

<pallas_src>
import functools
import math

import jax
import jax.numpy as jnp
from jax.experimental import pallas as pl
from jax.experimental.pallas import tpu as pltpu


def _round_up(x, m):
    return (x + m - 1) // m * m


# ----------------------------------------------------------------------------
# Pallas kernels
# ----------------------------------------------------------------------------
def _gemm_relu_kernel(a_ref, w_ref, o_ref, *, apply_relu):
    """(TM, K) @ (K, TN) on the MXU (bf16 in, f32 accum), fused ReLU."""
    acc = jnp.dot(a_ref[...], w_ref[...], preferred_element_type=jnp.float32)
    if apply_relu:
        acc = jnp.maximum(acc, 0.0)
    o_ref[...] = acc


def _maxpool4_kernel(a_ref, b_ref, c_ref, d_ref, o_ref):
    """Elementwise max of the 4 shifted views of a 2x2 max-pool window."""
    o_ref[...] = jnp.maximum(jnp.maximum(a_ref[...], b_ref[...]),
                             jnp.maximum(c_ref[...], d_ref[...]))


# ----------------------------------------------------------------------------
# Wrappers
# ----------------------------------------------------------------------------
def gemm_relu(a, w, *, apply_relu=True):
    """Tiled GEMM: a (M,K) f32, w (K,Cout) f32 -> (M,Cout) f32 (+ ReLU)."""
    M, K = a.shape
    K2, Cout = w.shape
    assert K == K2

    # Tile sizes: lane-dense, MXU-friendly, well under the v7x scoped-VMEM budget.
    TM = 256 if M >= 256 else _round_up(M, 16)
    Kp = _round_up(K, 128)
    Np = _round_up(Cout, 128)
    TN = 256 if (Np >= 256 and Np % 256 == 0) else 128
    Mp = _round_up(M, TM)

    # bf16 MXU operands (f32 accumulation inside the kernel); zero padding keeps
    # the dot exact and every block dense.
    a_p = jnp.pad(a.astype(jnp.bfloat16), ((0, Mp - M), (0, Kp - K)))
    w_p = jnp.pad(w.astype(jnp.bfloat16), ((0, Kp - K), (0, Np - Cout)))

    grid = (Mp // TM, Np // TN)
    kernel = functools.partial(_gemm_relu_kernel, apply_relu=apply_relu)
    cost = pl.CostEstimate(
        flops=2 * Mp * Kp * Np,
        transcendentals=0,
        bytes_accessed=(Mp * Kp + Kp * Np) * 2 + Mp * Np * 4,
    )

    out = pl.pallas_call(
        kernel,
        out_shape=jax.ShapeDtypeStruct((Mp, Np), jnp.float32),
        grid=grid,
        in_specs=[
            pl.BlockSpec((TM, Kp), lambda i, j: (i, 0)),
            pl.BlockSpec((Kp, TN), lambda i, j: (0, j)),
        ],
        out_specs=pl.BlockSpec((TM, TN), lambda i, j: (i, j)),
        compiler_params=pltpu.CompilerParams(
            dimension_semantics=("parallel", "parallel"),
            vmem_limit_bytes=32 * 1024 * 1024,
        ),
        cost_estimate=cost,
    )(a_p, w_p)
    return out[:M, :Cout]


def maxpool2x2(x_nhwc):
    """nn.MaxPool2d(2): kernel 2, stride 2 (floor)."""
    N, H, W, C = x_nhwc.shape
    OH, OW = H // 2, W // 2
    xc = x_nhwc[:, : 2 * OH, : 2 * OW, :]
    # Lane-dense (rows, OW*C) layout for the 4 shifted views.
    a = xc[:, 0::2, 0::2, :].reshape(N * OH, OW * C)
    b = xc[:, 0::2, 1::2, :].reshape(N * OH, OW * C)
    c = xc[:, 1::2, 0::2, :].reshape(N * OH, OW * C)
    d = xc[:, 1::2, 1::2, :].reshape(N * OH, OW * C)

    R, D = a.shape
    TR = R if R <= 512 else 512
    spec = pl.BlockSpec((TR, D), lambda i: (i, 0))

    out = pl.pallas_call(
        _maxpool4_kernel,
        out_shape=jax.ShapeDtypeStruct((R, D), jnp.float32),
        grid=(pl.cdiv(R, TR),),
        in_specs=[spec, spec, spec, spec],
        out_specs=spec,
        compiler_params=pltpu.CompilerParams(
            dimension_semantics=("parallel",)),
    )(a, b, c, d)
    return out.reshape(N, OH, OW, C)


def conv3x3_relu(x_nhwc, w_hwio):
    """ReflectionPad2d(1) + Conv2d(3x3, stride 1, bias=False) + ReLU."""
    N, H, W, Cin = x_nhwc.shape
    KH, KW, Cin2, Cout = w_hwio.shape
    assert Cin == Cin2 and KH == 3 and KW == 3
    # ReflectionPad2d(1) (pure data movement, fused into the jit).
    xp = jnp.pad(x_nhwc, ((0, 0), (1, 1), (1, 1), (0, 0)), mode="reflect")
    # im2col: tap-major, channel-minor -> matches w.reshape(KH*KW*Cin, Cout).
    cols = []
    for i in range(KH):
        for j in range(KW):
            cols.append(xp[:, i:i + H, j:j + W, :])
    patches = jnp.stack(cols, axis=3).reshape(N * H * W, KH * KW * Cin)
    out2d = gemm_relu(patches, w_hwio.reshape(KH * KW * Cin, Cout),
                      apply_relu=True)
    return out2d.reshape(N, H, W, Cout)


# ----------------------------------------------------------------------------
# Down forward:  MaxPool2d(2) -> [pad+conv+relu] x 2
# ----------------------------------------------------------------------------
def down_forward(x_nchw, params):
    x = jnp.transpose(x_nchw, (0, 2, 3, 1)).astype(jnp.float32)  # NCHW -> NHWC
    x = maxpool2x2(x)
    x = conv3x3_relu(x, params["w1"])
    x = conv3x3_relu(x, params["w2"])
    return jnp.transpose(x, (0, 3, 1, 2))  # back to NCHW like PyTorch


def init_params(key, in_channels, out_channels):
    k1, k2 = jax.random.split(key)
    # Weights in (KH, KW, Cin, Cout) layout; equivalent to Conv2d weights
    # (Cout, Cin, KH, KW) transposed.  Kaiming-ish scale, deterministic.
    w1 = jax.random.normal(k1, (3, 3, in_channels, out_channels),
                           jnp.float32) * (1.0 / math.sqrt(9 * in_channels))
    w2 = jax.random.normal(k2, (3, 3, out_channels, out_channels),
                           jnp.float32) * (1.0 / math.sqrt(9 * out_channels))
    return {"w1": w1, "w2": w2}


if __name__ == "__main__":
    key = jax.random.PRNGKey(0)
    k_in, k_par = jax.random.split(key)

    # Small shapes: batch=2, in_channels=4, spatial=16, out_channels=32.
    N, Cin, H, W = 2, 4, 16, 16
    Cout = 32
    x = jax.random.normal(k_in, (N, Cin, H, W), jnp.float32)
    params = init_params(k_par, Cin, Cout)

    fwd = jax.jit(down_forward)
    out = jax.block_until_ready(fwd(x, params))
    assert out.shape == (N, Cout, H // 2, W // 2), out.shape
    assert bool(jnp.all(jnp.isfinite(out)))
    print("KERNEL_OK")
</pallas_src>

<mosaic_0001>
module attributes {stable_mosaic.version = 11 : i64} {
  func.func @_maxpool4_kernel(%arg0: i32, %arg1: memref<16x32xf32, #tpu.memory_space<vmem>>, %arg2: memref<16x32xf32, #tpu.memory_space<vmem>>, %arg3: memref<16x32xf32, #tpu.memory_space<vmem>>, %arg4: memref<16x32xf32, #tpu.memory_space<vmem>>, %arg5: memref<16x32xf32, #tpu.memory_space<vmem>>) attributes {dimension_semantics = [#tpu.dimension_semantics<parallel>], iteration_bounds = array<i64: 1>, scalar_prefetch = 0 : i64, scratch_operands = 0 : i64, tpu.core_type = #tpu.core_type<tc>, window_params = [{transform_indices = @transform_0, window_bounds = array<i64: 16, 32>}, {transform_indices = @transform_1, window_bounds = array<i64: 16, 32>}, {transform_indices = @transform_2, window_bounds = array<i64: 16, 32>}, {transform_indices = @transform_3, window_bounds = array<i64: 16, 32>}, {transform_indices = @transform_4, window_bounds = array<i64: 16, 32>}]} {
    %c0 = arith.constant 0 : index
    %c0_0 = arith.constant 0 : index
    %0 = vector.load %arg1[%c0, %c0_0] : memref<16x32xf32, #tpu.memory_space<vmem>>, vector<16x32xf32>
    %c0_1 = arith.constant 0 : index
    %c0_2 = arith.constant 0 : index
    %1 = vector.load %arg2[%c0_1, %c0_2] : memref<16x32xf32, #tpu.memory_space<vmem>>, vector<16x32xf32>
    %2 = arith.maximumf %0, %1 : vector<16x32xf32>
    %c0_3 = arith.constant 0 : index
    %c0_4 = arith.constant 0 : index
    %3 = vector.load %arg3[%c0_3, %c0_4] : memref<16x32xf32, #tpu.memory_space<vmem>>, vector<16x32xf32>
    %c0_5 = arith.constant 0 : index
    %c0_6 = arith.constant 0 : index
    %4 = vector.load %arg4[%c0_5, %c0_6] : memref<16x32xf32, #tpu.memory_space<vmem>>, vector<16x32xf32>
    %5 = arith.maximumf %3, %4 : vector<16x32xf32>
    %6 = arith.maximumf %2, %5 : vector<16x32xf32>
    %c0_7 = arith.constant 0 : index
    %c0_8 = arith.constant 0 : index
    %7 = vector.load %arg5[%c0_7, %c0_8] : memref<16x32xf32, #tpu.memory_space<vmem>>, vector<16x32xf32>
    tpu.vector_store %arg5[%c0_7, %c0_8], %6 {strides = array<i32>} : memref<16x32xf32, #tpu.memory_space<vmem>>, vector<16x32xf32>,
    return
  }
  func.func @transform_0(%arg0: i32) -> (i32, i32) {
    %c0_i32 = arith.constant 0 : i32
    %c0_i32_0 = arith.constant 0 : i32
    return %arg0, %c0_i32 : i32, i32
  }
  func.func @transform_1(%arg0: i32) -> (i32, i32) {
    %c0_i32 = arith.constant 0 : i32
    %c0_i32_0 = arith.constant 0 : i32
    return %arg0, %c0_i32 : i32, i32
  }
  func.func @transform_2(%arg0: i32) -> (i32, i32) {
    %c0_i32 = arith.constant 0 : i32
    %c0_i32_0 = arith.constant 0 : i32
    return %arg0, %c0_i32 : i32, i32
  }
  func.func @transform_3(%arg0: i32) -> (i32, i32) {
    %c0_i32 = arith.constant 0 : i32
    %c0_i32_0 = arith.constant 0 : i32
    return %arg0, %c0_i32 : i32, i32
  }
  func.func @transform_4(%arg0: i32) -> (i32, i32) {
    %c0_i32 = arith.constant 0 : i32
    %c0_i32_0 = arith.constant 0 : i32
    return %arg0, %c0_i32 : i32, i32
  }
}

module attributes {stable_mosaic.version = 11 : i64} {
  func.func @_gemm_relu_kernel(%arg0: i32, %arg1: i32, %arg2: memref<128x128xbf16, #tpu.memory_space<vmem>>, %arg3: memref<128x128xbf16, #tpu.memory_space<vmem>>, %arg4: memref<128x128xf32, #tpu.memory_space<vmem>>) attributes {dimension_semantics = [#tpu.dimension_semantics<parallel>, #tpu.dimension_semantics<parallel>], iteration_bounds = array<i64: 1, 1>, scalar_prefetch = 0 : i64, scratch_operands = 0 : i64, tpu.core_type = #tpu.core_type<tc>, window_params = [{transform_indices = @transform_0, window_bounds = array<i64: 128, 128>}, {transform_indices = @transform_1, window_bounds = array<i64: 128, 128>}, {transform_indices = @transform_2, window_bounds = array<i64: 128, 128>}]} {
    %c0 = arith.constant 0 : index
    %c0_0 = arith.constant 0 : index
    %0 = vector.load %arg2[%c0, %c0_0] : memref<128x128xbf16, #tpu.memory_space<vmem>>, vector<128x128xbf16>
    %c0_1 = arith.constant 0 : index
    %c0_2 = arith.constant 0 : index
    %1 = vector.load %arg3[%c0_1, %c0_2] : memref<128x128xbf16, #tpu.memory_space<vmem>>, vector<128x128xbf16>
    %cst = arith.constant dense<0.000000e+00> : vector<128x128xf32>
    %2 = tpu.matmul %0, %1, %cst {dimension_numbers = #tpu.dot_dimension_numbers<[1], [0], [0], [1], [0, 0, 1, 1], [], []>} : vector<128x128xbf16>, vector<128x128xbf16>, vector<128x128xf32> -> vector<128x128xf32>
    %cst_3 = arith.constant 0.000000e+00 : f32
    %3 = vector.broadcast %cst_3 : f32 to vector<128x128xf32>
    %4 = arith.maximumf %2, %3 : vector<128x128xf32>
    %c0_4 = arith.constant 0 : index
    %c0_5 = arith.constant 0 : index
    %5 = vector.load %arg4[%c0_4, %c0_5] : memref<128x128xf32, #tpu.memory_space<vmem>>, vector<128x128xf32>
    tpu.vector_store %arg4[%c0_4, %c0_5], %4 {strides = array<i32>} : memref<128x128xf32, #tpu.memory_space<vmem>>, vector<128x128xf32>,
    return
  }
  func.func @transform_0(%arg0: i32, %arg1: i32) -> (i32, i32) {
    %c0_i32 = arith.constant 0 : i32
    %c0_i32_0 = arith.constant 0 : i32
    return %arg0, %c0_i32 : i32, i32
  }
  func.func @transform_1(%arg0: i32, %arg1: i32) -> (i32, i32) {
    %c0_i32 = arith.constant 0 : i32
    %c0_i32_0 = arith.constant 0 : i32
    return %c0_i32, %arg1 : i32, i32
  }
  func.func @transform_2(%arg0: i32, %arg1: i32) -> (i32, i32) {
    %c0_i32 = arith.constant 0 : i32
    return %arg0, %arg1 : i32, i32
  }
}

module attributes {stable_mosaic.version = 11 : i64} {
  func.func @_gemm_relu_kernel(%arg0: i32, %arg1: i32, %arg2: memref<128x384xbf16, #tpu.memory_space<vmem>>, %arg3: memref<384x128xbf16, #tpu.memory_space<vmem>>, %arg4: memref<128x128xf32, #tpu.memory_space<vmem>>) attributes {dimension_semantics = [#tpu.dimension_semantics<parallel>, #tpu.dimension_semantics<parallel>], iteration_bounds = array<i64: 1, 1>, scalar_prefetch = 0 : i64, scratch_operands = 0 : i64, tpu.core_type = #tpu.core_type<tc>, window_params = [{transform_indices = @transform_0, window_bounds = array<i64: 128, 384>}, {transform_indices = @transform_1, window_bounds = array<i64: 384, 128>}, {transform_indices = @transform_2, window_bounds = array<i64: 128, 128>}]} {
    %c0 = arith.constant 0 : index
    %c0_0 = arith.constant 0 : index
    %0 = vector.load %arg2[%c0, %c0_0] : memref<128x384xbf16, #tpu.memory_space<vmem>>, vector<128x384xbf16>
    %c0_1 = arith.constant 0 : index
    %c0_2 = arith.constant 0 : index
    %1 = vector.load %arg3[%c0_1, %c0_2] : memref<384x128xbf16, #tpu.memory_space<vmem>>, vector<384x128xbf16>
    %cst = arith.constant dense<0.000000e+00> : vector<128x128xf32>
    %2 = tpu.matmul %0, %1, %cst {dimension_numbers = #tpu.dot_dimension_numbers<[1], [0], [0], [1], [0, 0, 1, 1], [], []>} : vector<128x384xbf16>, vector<384x128xbf16>, vector<128x128xf32> -> vector<128x128xf32>
    %cst_3 = arith.constant 0.000000e+00 : f32
    %3 = vector.broadcast %cst_3 : f32 to vector<128x128xf32>
    %4 = arith.maximumf %2, %3 : vector<128x128xf32>
    %c0_4 = arith.constant 0 : index
    %c0_5 = arith.constant 0 : index
    %5 = vector.load %arg4[%c0_4, %c0_5] : memref<128x128xf32, #tpu.memory_space<vmem>>, vector<128x128xf32>
    tpu.vector_store %arg4[%c0_4, %c0_5], %4 {strides = array<i32>} : memref<128x128xf32, #tpu.memory_space<vmem>>, vector<128x128xf32>,
    return
  }
  func.func @transform_0(%arg0: i32, %arg1: i32) -> (i32, i32) {
    %c0_i32 = arith.constant 0 : i32
    %c0_i32_0 = arith.constant 0 : i32
    return %arg0, %c0_i32 : i32, i32
  }
  func.func @transform_1(%arg0: i32, %arg1: i32) -> (i32, i32) {
    %c0_i32 = arith.constant 0 : i32
    %c0_i32_0 = arith.constant 0 : i32
    return %c0_i32, %arg1 : i32, i32
  }
  func.func @transform_2(%arg0: i32, %arg1: i32) -> (i32, i32) {
    %c0_i32 = arith.constant 0 : i32
    return %arg0, %arg1 : i32, i32
  }
}

</mosaic_0001>

<bundles_post_ra>
// kernel: down_forward.3
= control target key start
LH: loop header
LB: loop body
LE: loop exit
PB: predicated region body
PF: predicated region fallthrough
CT: control target
= control target key end

     0   :  { %vm31_vm0 = vcmask 261120   ;;  %s93_s0 = inlined_call_operand.vmem [shape: f32[16,32], index: 0, kind: input, shape index: {}]   ;;  %s94_s1 = inlined_call_operand.vmem [shape: f32[16,32], index: 1, kind: input, shape index: {}]   ;;  %s95_s2 = inlined_call_operand.vmem [shape: f32[16,32], index: 2, kind: input, shape index: {}]   ;;  %s96_s3 = inlined_call_operand.vmem [shape: f32[16,32], index: 3, kind: input, shape index: {}]   ;;  %s97_s4 = inlined_call_operand.vmem [shape: f32[16,32], index: 4, kind: output, shape index: {}]  }
   0x1   :  { %v17_v0 = vld [vmem:[%s93_s0] sm:$0xff]  ;;  %v18_v5 = vld [vmem:[%s93_s0 + $0x8] sm:$0xff] }
   0x2   :  { %v19_v1 = vld [vmem:[%s94_s1] sm:$0xff]  ;;  %v20_v6 = vld [vmem:[%s94_s1 + $0x8] sm:$0xff] }
   0x3   :  { %v23_v2 = vld [vmem:[%s95_s2] sm:$0xff]  ;;  %v21_v3 = vmax.f32 %v17_v0, %v19_v1  ;;  %v22_v8 = vmax.f32 %v18_v5, %v20_v6  ;;  %v24_v9 = vld [vmem:[%s95_s2 + $0x8] sm:$0xff] }
   0x4   :  { %v25_v4 = vld [vmem:[%s96_s3] sm:$0xff]  ;;  %v26_v10 = vld [vmem:[%s96_s3 + $0x8] sm:$0xff] }
   0x5   :  { %v27_v7 = vmax.f32 %v23_v2, %v25_v4  ;;  %v28_v11 = vmax.f32 %v24_v9, %v26_v10 }
   0x7   :  { %v29_v12 = vmax.f32 %v21_v3, %v27_v7  ;;  %v30_v13 = vmax.f32 %v22_v8, %v28_v11 }
   0x9   :  { %32 = vst.msk [vmem:[%s97_s4] sm:$0xff] %vm31_vm0, %v29_v12  ;;  %33 = vst.msk [vmem:[%s97_s4 + $0x8] sm:$0xff] %vm31_vm0, %v30_v13 }

// kernel: down_forward.4
= control target key start
LH: loop header
LB: loop body
LE: loop exit
PB: predicated region body
PF: predicated region fallthrough
CT: control target
= control target key end

     0   :  { %s480_s1 = inlined_call_operand.vmem [shape: bf16[128,128], index: 1, kind: input, shape index: {}]   ;;  %s481_s0 = inlined_call_operand.vmem [shape: bf16[128,128], index: 0, kind: input, shape index: {}]   ;;  %s482_s2 = inlined_call_operand.vmem [shape: f32[128,128], index: 2, kind: output, shape index: {}]  }
   0x1   :  { %v353_v0 = vld [vmem:[%s480_s1] sm:$0xff]   ;;  %v354_v1 = vld [vmem:[%s480_s1 + $0x8] sm:$0xff]   ;;  %v355_v2 = vld [vmem:[%s480_s1 + $0x10] sm:$0xff]  }
   0x2   :  { %305 = vmatprep.subr.bf16.mxu0 %v353_v0  ;;  %337 = vmatprep.subr.bf16.mxu1 %v353_v0  ;;  %v356_v3 = vld [vmem:[%s480_s1 + $0x18] sm:$0xff]   ;;  %v361_v4 = vld [vmem:[%s481_s0] sm:$0xff]   ;;  %v358_v7 = vld [vmem:[%s480_s1 + $0x28] sm:$0xff]  }
   0x3   :  { %306 = vmatpush3.bf16.msra.mxu0 %v353_v0  ;;  %345 = vmatpush3.bf16.msra.mxu1 %v353_v0  ;;  %v362_v5 = vld [vmem:[%s481_s0 + $0x20] sm:$0xff]   ;;  %v359_v8 = vld [vmem:[%s480_s1 + $0x30] sm:$0xff]   ;;  %v360_v9 = vld [vmem:[%s480_s1 + $0x38] sm:$0xff]  }
   0x4   :  { %307 = vmatprep.subr.bf16.mxu0 %v354_v1  ;;  %338 = vmatprep.subr.bf16.mxu1 %v354_v1  ;;  %v357_v6 = vld [vmem:[%s480_s1 + $0x20] sm:$0xff]   ;;  %v363_v10 = vld [vmem:[%s481_s0 + $0x8] sm:$0xff]   ;;  %v365_v12 = vld [vmem:[%s481_s0 + $0x10] sm:$0xff]  }
   0x5   :  { %321 = vmatprep.mubr.bf16.mxu0 %v361_v4  ;;  %329 = vmatprep.mubr.bf16.mxu1 %v362_v5  ;;  %v364_v11 = vld [vmem:[%s481_s0 + $0x28] sm:$0xff]   ;;  %v366_v13 = vld [vmem:[%s481_s0 + $0x30] sm:$0xff]   ;;  %v367_v14 = vld [vmem:[%s481_s0 + $0x18] sm:$0xff]  }
   0x6   :  { %v368_v15 = vld [vmem:[%s481_s0 + $0x38] sm:$0xff]  }
   0x7   :  { %308 = vmatpush3.bf16.msra.mxu0 %v354_v1  ;;  %346 = vmatpush3.bf16.msra.mxu1 %v354_v1 }
   0x8   :  { %309 = vmatprep.subr.bf16.mxu0 %v355_v2  ;;  %339 = vmatprep.subr.bf16.mxu1 %v355_v2 }
   0xb   :  { %310 = vmatpush3.bf16.msra.mxu0 %v355_v2  ;;  %347 = vmatpush3.bf16.msra.mxu1 %v355_v2 }
   0xc   :  { %311 = vmatprep.subr.bf16.mxu0 %v356_v3  ;;  %340 = vmatprep.subr.bf16.mxu1 %v356_v3 }
   0xf   :  { %312 = vmatpush3.bf16.msra.mxu0 %v356_v3  ;;  %348 = vmatpush3.bf16.msra.mxu1 %v356_v3 }
  0x10   :  { %313 = vmatprep.subr.bf16.mxu0 %v357_v6  ;;  %341 = vmatprep.subr.bf16.mxu1 %v357_v6 }
  0x13   :  { %314 = vmatpush3.bf16.msra.mxu0 %v357_v6  ;;  %349 = vmatpush3.bf16.msra.mxu1 %v357_v6 }
  0x14   :  { %315 = vmatprep.subr.bf16.mxu0 %v358_v7  ;;  %342 = vmatprep.subr.bf16.mxu1 %v358_v7 }
  0x17   :  { %316 = vmatpush3.bf16.msra.mxu0 %v358_v7  ;;  %350 = vmatpush3.bf16.msra.mxu1 %v358_v7 }
  0x18   :  { %317 = vmatprep.subr.bf16.mxu0 %v359_v8  ;;  %343 = vmatprep.subr.bf16.mxu1 %v359_v8 }
  0x1b   :  { %318 = vmatpush3.bf16.msra.mxu0 %v359_v8  ;;  %351 = vmatpush3.bf16.msra.mxu1 %v359_v8 }
  0x1c   :  { %319 = vmatprep.subr.bf16.mxu0 %v360_v9  ;;  %344 = vmatprep.subr.bf16.mxu1 %v360_v9 }
  0x1f   :  { %320 = vmatpush3.bf16.msra.mxu0 %v360_v9  ;;  %352 = vmatpush3.bf16.msra.mxu1 %v360_v9 }
  0x22   :  { %322 = vmatmul.mubr.bf16.vlgmr.msra.gmra.mrb[0].mxu0 %v363_v10  ;;  %330 = vmatmul.mubr.bf16.vlgmr.msra.gmra.mrb[0].mxu1 %v364_v11 }
  0x23   :  { %325 = vmatprep.mubr.bf16.mxu0 %v365_v12  ;;  %333 = vmatprep.mubr.bf16.mxu1 %v366_v13 }
  0x2a   :  { %326 = vmatmul.mubr.bf16.gmra.mrb[4].mxu0 %v367_v14  ;;  %334 = vmatmul.mubr.bf16.gmra.mrb[4].mxu1 %v368_v15 }
  0xf5   :  { %v323_v16 = vpop.f32.mrb[0].mxu0  ;;  %v331_v17 = vpop.f32.mrb[0].mxu1 }
  0xf6   :  { %v239_v18 = vmax.f32 %v323_v16, 0.0  ;;  %v247_v19 = vmax.f32 %v331_v17, 0.0  ;;  %v174_v20 = vpop.f32.mrb[1].mxu0  ;;  %v206_v21 = vpop.f32.mrb[1].mxu1 }
  0xf7   :  { %v237_v22 = vmax.f32 %v174_v20, 0.0  ;;  %v245_v23 = vmax.f32 %v206_v21, 0.0  ;;  %v324_v24 = vpop.f32.mrb[2].mxu0  ;;  %v332_v25 = vpop.f32.mrb[2].mxu1 }
  0xf8   :  { %255 = vst [vmem:[%s482_s2 + $0x10] sm:$0xff] %v239_v18  ;;  %263 = vst [vmem:[%s482_s2 + $0x50] sm:$0xff] %v247_v19  ;;  %v240_v26 = vmax.f32 %v324_v24, 0.0  ;;  %v248_v27 = vmax.f32 %v332_v25, 0.0  ;;  %v177_v28 = vpop.f32.mrb[3].mxu0  ;;  %v209_v29 = vpop.f32.mrb[3].mxu1 }
  0xf9   :  { %253 = vst [vmem:[%s482_s2] sm:$0xff] %v237_v22  ;;  %261 = vst [vmem:[%s482_s2 + $0x40] sm:$0xff] %v245_v23  ;;  %v238_v30 = vmax.f32 %v177_v28, 0.0  ;;  %v246_v31 = vmax.f32 %v209_v29, 0.0 }
  0xfa   :  { %256 = vst [vmem:[%s482_s2 + $0x18] sm:$0xff] %v240_v26  ;;  %264 = vst [vmem:[%s482_s2 + $0x58] sm:$0xff] %v248_v27 }
  0xfb   :  { %254 = vst [vmem:[%s482_s2 + $0x8] sm:$0xff] %v238_v30  ;;  %262 = vst [vmem:[%s482_s2 + $0x48] sm:$0xff] %v246_v31 }
  0xfd   :  { %v327_v32 = vpop.f32.mrb[4].mxu0  ;;  %v335_v33 = vpop.f32.mrb[4].mxu1 }
  0xfe   :  { %v243_v34 = vmax.f32 %v327_v32, 0.0  ;;  %v251_v35 = vmax.f32 %v335_v33, 0.0  ;;  %v190_v36 = vpop.f32.mrb[5].mxu0  ;;  %v222_v37 = vpop.f32.mrb[5].mxu1 }
  0xff   :  { %v241_v38 = vmax.f32 %v190_v36, 0.0  ;;  %v249_v39 = vmax.f32 %v222_v37, 0.0  ;;  %v328_v40 = vpop.f32.mrb[6].mxu0  ;;  %v336_v41 = vpop.f32.mrb[6].mxu1 }
 0x100   :  { %259 = vst [vmem:[%s482_s2 + $0x30] sm:$0xff] %v243_v34  ;;  %267 = vst [vmem:[%s482_s2 + $0x70] sm:$0xff] %v251_v35  ;;  %v244_v42 = vmax.f32 %v328_v40, 0.0  ;;  %v252_v43 = vmax.f32 %v336_v41, 0.0  ;;  %v193_v44 = vpop.f32.mrb[7].mxu0  ;;  %v225_v45 = vpop.f32.mrb[7].mxu1 }
 0x101   :  { %257 = vst [vmem:[%s482_s2 + $0x20] sm:$0xff] %v241_v38  ;;  %265 = vst [vmem:[%s482_s2 + $0x60] sm:$0xff] %v249_v39  ;;  %v242_v46 = vmax.f32 %v193_v44, 0.0  ;;  %v250_v47 = vmax.f32 %v225_v45, 0.0 }
 0x102   :  { %260 = vst [vmem:[%s482_s2 + $0x38] sm:$0xff] %v244_v42  ;;  %268 = vst [vmem:[%s482_s2 + $0x78] sm:$0xff] %v252_v43 }
 0x103   :  { %258 = vst [vmem:[%s482_s2 + $0x28] sm:$0xff] %v242_v46  ;;  %266 = vst [vmem:[%s482_s2 + $0x68] sm:$0xff] %v250_v47 }

// kernel: down_forward.5
= control target key start
LH: loop header
LB: loop body
LE: loop exit
PB: predicated region body
PF: predicated region fallthrough
CT: control target
= control target key end

     0   :  { %s1024_s0 = inlined_call_operand.vmem [shape: bf16[128,384], index: 0, kind: input, shape index: {}]   ;;  %s1025_s1 = inlined_call_operand.vmem [shape: bf16[384,128], index: 1, kind: input, shape index: {}]   ;;  %s1026_s2 = inlined_call_operand.hbm [shape: f32[128,128], index: 2, kind: output, shape index: {}]  }
   0x1   :  { %v770_v0 = vld [vmem:[%s1025_s1 + $0x40] sm:$0xff]   ;;  %v773_v3 = vld [vmem:[%s1025_s1 + $0x48] sm:$0xff]   ;;  %v776_v6 = vld [vmem:[%s1025_s1 + $0x50] sm:$0xff]  }
   0x2   :  { %v771_v1 = vld [vmem:[%s1025_s1] sm:$0xff]   ;;  %655 = vmatprep.subr.bf16.mxu0 %v770_v0  ;;  %v774_v4 = vld [vmem:[%s1025_s1 + $0x8] sm:$0xff]   ;;  %v777_v7 = vld [vmem:[%s1025_s1 + $0x10] sm:$0xff]  }
   0x3   :  { %v772_v2 = vld [vmem:[%s1025_s1 + $0x80] sm:$0xff]   ;;  %656 = vmatpush3.bf16.msra.mxu0 %v771_v1  ;;  %v775_v5 = vld [vmem:[%s1025_s1 + $0x88] sm:$0xff]   ;;  %v778_v8 = vld [vmem:[%s1025_s1 + $0x90] sm:$0xff]  }
   0x4   :  { %735 = vmatprep.subr.bf16.mxu1 %v772_v2  ;;  %657 = vmatprep.subr.bf16.mxu0 %v773_v3  ;;  %v779_v9 = vld [vmem:[%s1025_s1 + $0x58] sm:$0xff]   ;;  %v782_v12 = vld [vmem:[%s1025_s1 + $0x60] sm:$0xff]   ;;  %v785_v15 = vld [vmem:[%s1025_s1 + $0x68] sm:$0xff]  }
   0x5   :  { %736 = vmatpush3.bf16.msra.mxu1 %v772_v2  ;;  %v780_v10 = vld [vmem:[%s1025_s1 + $0x18] sm:$0xff]   ;;  %v784_v13 = vld [vmem:[%s1025_s1 + $0xa0] sm:$0xff]   ;;  %v787_v16 = vld [vmem:[%s1025_s1 + $0xa8] sm:$0xff]  }
   0x6   :  { %737 = vmatprep.subr.bf16.mxu1 %v775_v5  ;;  %v781_v11 = vld [vmem:[%s1025_s1 + $0x98] sm:$0xff]   ;;  %v783_v14 = vld [vmem:[%s1025_s1 + $0x20] sm:$0xff]   ;;  %v786_v17 = vld [vmem:[%s1025_s1 + $0x28] sm:$0xff]  }
   0x7   :  { %658 = vmatpush3.bf16.msra.mxu0 %v774_v4  ;;  %v788_v18 = vld [vmem:[%s1025_s1 + $0x70] sm:$0xff]   ;;  %v791_v21 = vld [vmem:[%s1025_s1 + $0x78] sm:$0xff]   ;;  %v794_v26 = vld [vmem:[%s1024_s0] ss:$12 sps:$4 sm:$0xff]  }
   0x8   :  { %659 = vmatprep.subr.bf16.mxu0 %v776_v6  ;;  %v789_v19 = vld [vmem:[%s1025_s1 + $0x30] sm:$0xff]   ;;  %v793_v22 = vld [vmem:[%s1025_s1 + $0xb8] sm:$0xff]   ;;  %v798_v28 = vld [vmem:[%s1024_s0 + $0x20] ss:$12 sps:$4 sm:$0xff]  }
   0x9   :  { %738 = vmatpush3.bf16.msra.mxu1 %v775_v5  ;;  %v790_v20 = vld [vmem:[%s1025_s1 + $0xb0] sm:$0xff]   ;;  %v792_v25 = vld [vmem:[%s1025_s1 + $0x38] sm:$0xff]  }
   0xa   :  { %739 = vmatprep.subr.bf16.mxu1 %v778_v8  ;;  %v796_v23 = vld [vmem:[%s1024_s0 + $0x4] ss:$12 sps:$4 sm:$0xff]   ;;  %v797_v24 = vld [vmem:[%s1024_s0 + $0x8] ss:$12 sps:$4 sm:$0xff]  }
   0xb   :  { %660 = vmatpush3.bf16.msra.mxu0 %v777_v7  ;;  %397 = vmatprep.mubr.bf16.mxu0 %v796_v23  ;;  %v799_v27 = vld [vmem:[%s1024_s0 + $0x1c] ss:$12 sps:$4 sm:$0xff]   ;;  %v805_v29 = vld [vmem:[%s1024_s0 + $0x38] ss:$12 sps:$4 sm:$0xff]   ;;  %v802_v31 = vld [vmem:[%s1024_s0 + $0x34] ss:$12 sps:$4 sm:$0xff]  }
   0xc   :  { %661 = vmatprep.subr.bf16.mxu0 %v779_v9  ;;  %751 = vmatprep.mubr.bf16.mxu1 %v797_v24  ;;  %v801_v30 = vld [vmem:[%s1024_s0 + $0x18] ss:$12 sps:$4 sm:$0xff]   ;;  %v806_v32 = vld [vmem:[%s1024_s0 + $0x50] ss:$12 sps:$4 sm:$0xff]   ;;  %v813_v33 = vld [vmem:[%s1024_s0 + $0x68] ss:$12 sps:$4 sm:$0xff]  }
   0xd   :  { %740 = vmatpush3.bf16.msra.mxu1 %v778_v8 }
   0xe   :  { %741 = vmatprep.subr.bf16.mxu1 %v781_v11 }
   0xf   :  { %662 = vmatpush3.bf16.msra.mxu0 %v780_v10 }
  0x10   :  { %663 = vmatprep.subr.bf16.mxu0 %v782_v12 }
  0x11   :  { %742 = vmatpush3.bf16.msra.mxu1 %v781_v11 }
  0x12   :  { %743 = vmatprep.subr.bf16.mxu1 %v784_v13 }
  0x13   :  { %664 = vmatpush3.bf16.msra.mxu0 %v783_v14 }
  0x14   :  { %665 = vmatprep.subr.bf16.mxu0 %v785_v15 }
  0x15   :  { %744 = vmatpush3.bf16.msra.mxu1 %v784_v13 }
  0x16   :  { %745 = vmatprep.subr.bf16.mxu1 %v787_v16 }
  0x17   :  { %666 = vmatpush3.bf16.msra.mxu0 %v786_v17 }
  0x18   :  { %667 = vmatprep.subr.bf16.mxu0 %v788_v18 }
  0x19   :  { %746 = vmatpush3.bf16.msra.mxu1 %v787_v16 }
  0x1a   :  { %747 = vmatprep.subr.bf16.mxu1 %v790_v20 }
  0x1b   :  { %668 = vmatpush3.bf16.msra.mxu0 %v789_v19 }
  0x1c   :  { %669 = vmatprep.subr.bf16.mxu0 %v791_v21 }
  0x1d   :  { %748 = vmatpush3.bf16.msra.mxu1 %v790_v20 }
  0x1e   :  { %749 = vmatprep.subr.bf16.mxu1 %v793_v22 }
  0x1f   :  { %670 = vmatpush3.bf16.msra.mxu0 %v792_v25 }
  0x21   :  { %750 = vmatpush3.bf16.msra.mxu1 %v793_v22 }
  0x22   :  { %398 = vmatmul.mubr.bf16.vlgmr.msra.gmra.mrb[0].mxu0 %v794_v26 }
  0x23   :  { %405 = vmatprep.mubr.bf16.mxu0 %v799_v27 }
  0x24   :  { %752 = vmatmul.mubr.bf16.vlgmr.msra.gmra.mrb[0].mxu1 %v798_v28 }
  0x25   :  { %755 = vmatprep.mubr.bf16.mxu1 %v805_v29 }
  0x2a   :  { %406 = vmatmul.mubr.bf16.gmra.mrb[4].mxu0 %v801_v30 }
  0x2b   :  { %7 = vsyncpa [#allocation3], 0  ;;  %413 = vmatprep.mubr.bf16.mxu0 %v802_v31  ;;  %v804_v34 = vld [vmem:[%s1024_s0 + $0x30] ss:$12 sps:$4 sm:$0xff]   ;;  %v807_v35 = vld [vmem:[%s1024_s0 + $0x4c] ss:$12 sps:$4 sm:$0xff]  }
  0x2c   :  { %756 = vmatmul.mubr.bf16.gmra.mrb[4].mxu1 %v806_v32  ;;  %v814_v36 = vld [vmem:[%s1024_s0 + $0x80] ss:$12 sps:$4 sm:$0xff]   ;;  %v821_v37 = vld [vmem:[%s1024_s0 + $0x98] ss:$12 sps:$4 sm:$0xff]   ;;  %v809_v38 = vld [vmem:[%s1024_s0 + $0x48] ss:$12 sps:$4 sm:$0xff]  }
  0x2d   :  { %759 = vmatprep.mubr.bf16.mxu1 %v813_v33  ;;  %v810_v39 = vld [vmem:[%s1024_s0 + $0x64] ss:$12 sps:$4 sm:$0xff]   ;;  %v812_v41 = vld [vmem:[%s1024_s0 + $0x60] ss:$12 sps:$4 sm:$0xff]   ;;  %v815_v42 = vld [vmem:[%s1024_s0 + $0x7c] ss:$12 sps:$4 sm:$0xff]  }
  0x2e   :  { %v822_v40 = vld [vmem:[%s1024_s0 + $0xb0] ss:$12 sps:$4 sm:$0xff]   ;;  %v817_v43 = vld [vmem:[%s1024_s0 + $0x78] ss:$12 sps:$4 sm:$0xff]   ;;  %v818_v44 = vld [vmem:[%s1024_s0 + $0x94] ss:$12 sps:$4 sm:$0xff]  }
  0x2f   :  { %v820_v45 = vld [vmem:[%s1024_s0 + $0x90] ss:$12 sps:$4 sm:$0xff]   ;;  %v823_v46 = vld [vmem:[%s1024_s0 + $0xac] ss:$12 sps:$4 sm:$0xff]   ;;  %v825_v47 = vld [vmem:[%s1024_s0 + $0xa8] ss:$12 sps:$4 sm:$0xff]  }
  0x30   :  { %s850_s0 = smov [#allocation2]  }
  0x31   :  { %s596_s19 = sshll.u32 %s850_s0, 4  ;;  %s597_s19 = int_to_ptr.vmem [resolvable:$true] %s596_s19 }
  0x32   :  { %414 = vmatmul.mubr.bf16.gmra.mrb[8].mxu0 %v804_v34  ;;  %s826_s20 = scalar_lea.vmem %s597_s19, 2048  ;;  %p831_p1 = scmp.lt.s32.totalorder %s597_s19, %s597_s19 }
  0x33   :  { %421 = vmatprep.mubr.bf16.mxu0 %v807_v35  ;;  %p827_p0 = scmp.ne.s32.totalorder %s597_s19, %s826_s20  ;;  %p832_p2 = scmp.lt.s32.totalorder %s826_s20, %s826_s20 }
  0x34   :  { %760 = vmatmul.mubr.bf16.gmra.mrb[8].mxu1 %v814_v36 }
  0x35   :  { %763 = vmatprep.mubr.bf16.mxu1 %v821_v37  ;;  %p833_p3 = por %p832_p2, %p831_p1 }
  0x37   :  { %p834_p4 = pnand %p833_p3, %p827_p0 }
  0x3a   :  { %422 = vmatmul.mubr.bf16.gmra.mrb[12].mxu0 %v809_v38 }
  0x3b   :  { %429 = vmatprep.mubr.bf16.mxu0 %v810_v39 }
  0x3c   :  { %764 = vmatmul.mubr.bf16.gmra.mrb[12].mxu1 %v822_v40 }
  0x42   :  { %430 = vmatmul.mubr.bf16.gmra.mrb[16].mxu0 %v812_v41 }
  0x43   :  { %437 = vmatprep.mubr.bf16.mxu0 %v815_v42 }
  0x4a   :  { %438 = vmatmul.mubr.bf16.gmra.mrb[20].mxu0 %v817_v43 }
  0x4b   :  { %445 = vmatprep.mubr.bf16.mxu0 %v818_v44 }
  0x52   :  { %446 = vmatmul.mubr.bf16.gmra.mrb[24].mxu0 %v820_v45 }
  0x53   :  { %453 = vmatprep.mubr.bf16.mxu0 %v823_v46 }
  0x5a   :  { %454 = vmatmul.mubr.bf16.gmra.mrb[28].mxu0 %v825_v47 }
  0xf5   :  { %v671_v48 = vpop.f32.mrb[0].mxu0 }
  0xf6   :  { %v672_v49 = vpop.f32.mrb[1].mxu0 }
  0xf7   :  { %v673_v50 = vadd.f32 %v672_v49, %v671_v48  ;;  %v674_v51 = vpop.f32.mrb[2].mxu0  ;;  %v753_v52 = vpop.f32.mrb[0].mxu1 }
  0xf8   :  { %v675_v53 = vpop.f32.mrb[3].mxu0  ;;  %v496_v54 = vpop.f32.mrb[1].mxu1 }
  0xf9   :  { %v676_v55 = vadd.f32 %v675_v53, %v674_v51  ;;  %v497_v56 = vadd.f32 %v673_v50, %v496_v54  ;;  %v754_v57 = vpop.f32.mrb[2].mxu1 }
  0xfa   :  { %v499_v58 = vpop.f32.mrb[3].mxu1 }
  0xfb   :  { %v559_v59 = vmax.f32 %v497_v56, 0.0  ;;  %v500_v60 = vadd.f32 %v676_v55, %v499_v58 }
  0xfd   :  { %575 = vst [vmem:[#allocation2] sm:$0xff] %v559_v59  ;;  %v560_v61 = vmax.f32 %v500_v60, 0.0  ;;  %v677_v62 = vpop.f32.mrb[4].mxu0 }
  0xfe   :  { %v678_v63 = vpop.f32.mrb[5].mxu0 }
  0xff   :  { %576 = vst [vmem:[#allocation2 + $0x8] sm:$0xff] %v560_v61  ;;  %v679_v0 = vadd.f32 %v678_v63, %v677_v62  ;;  %v680_v1 = vpop.f32.mrb[6].mxu0  ;;  %v757_v2 = vpop.f32.mrb[4].mxu1 }
 0x100   :  { %v681_v3 = vpop.f32.mrb[7].mxu0  ;;  %v512_v4 = vpop.f32.mrb[5].mxu1 }
 0x101   :  { %v505_v5 = vadd.f32 %v753_v52, %v679_v0  ;;  %v682_v6 = vadd.f32 %v681_v3, %v680_v1  ;;  %v758_v7 = vpop.f32.mrb[6].mxu1 }
 0x102   :  { %v515_v8 = vpop.f32.mrb[7].mxu1 }
 0x103   :  { %v561_v9 = vmax.f32 %v505_v5, 0.0  ;;  %v508_v10 = vadd.f32 %v754_v57, %v682_v6 }
 0x105   :  { %577 = vst [vmem:[#allocation2 + $0x10] sm:$0xff] %v561_v9  ;;  %v562_v11 = vmax.f32 %v508_v10, 0.0  ;;  %v683_v12 = vpop.f32.mrb[8].mxu0 }
 0x106   :  { %v684_v13 = vpop.f32.mrb[9].mxu0 }
 0x107   :  { %578 = vst [vmem:[#allocation2 + $0x18] sm:$0xff] %v562_v11  ;;  %v685_v14 = vadd.f32 %v684_v13, %v683_v12  ;;  %v686_v15 = vpop.f32.mrb[10].mxu0  ;;  %v761_v16 = vpop.f32.mrb[8].mxu1 }
 0x108   :  { %v687_v17 = vpop.f32.mrb[11].mxu0  ;;  %v528_v18 = vpop.f32.mrb[9].mxu1 }
 0x109   :  { %v688_v19 = vadd.f32 %v687_v17, %v686_v15  ;;  %v513_v20 = vadd.f32 %v685_v14, %v512_v4  ;;  %v762_v21 = vpop.f32.mrb[10].mxu1 }
 0x10a   :  { %v531_v22 = vpop.f32.mrb[11].mxu1 }
 0x10b   :  { %v563_v23 = vmax.f32 %v513_v20, 0.0  ;;  %v516_v24 = vadd.f32 %v688_v19, %v515_v8 }
 0x10d   :  { %579 = vst [vmem:[#allocation2 + $0x20] sm:$0xff] %v563_v23  ;;  %v564_v25 = vmax.f32 %v516_v24, 0.0  ;;  %v689_v26 = vpop.f32.mrb[12].mxu0 }
 0x10e   :  { %v690_v27 = vpop.f32.mrb[13].mxu0 }
 0x10f   :  { %580 = vst [vmem:[#allocation2 + $0x28] sm:$0xff] %v564_v25  ;;  %v691_v28 = vadd.f32 %v690_v27, %v689_v26  ;;  %v692_v29 = vpop.f32.mrb[14].mxu0  ;;  %v765_v30 = vpop.f32.mrb[12].mxu1 }
 0x110   :  { %v693_v31 = vpop.f32.mrb[15].mxu0  ;;  %v544_v32 = vpop.f32.mrb[13].mxu1 }
 0x111   :  { %v521_v33 = vadd.f32 %v757_v2, %v691_v28  ;;  %v694_v34 = vadd.f32 %v693_v31, %v692_v29  ;;  %v766_v35 = vpop.f32.mrb[14].mxu1 }
 0x112   :  { %v547_v36 = vpop.f32.mrb[15].mxu1 }
 0x113   :  { %v565_v37 = vmax.f32 %v521_v33, 0.0  ;;  %v524_v38 = vadd.f32 %v758_v7, %v694_v34 }
 0x115   :  { %581 = vst [vmem:[#allocation2 + $0x30] sm:$0xff] %v565_v37  ;;  %v566_v39 = vmax.f32 %v524_v38, 0.0  ;;  %v695_v40 = vpop.f32.mrb[16].mxu0 }
 0x116   :  { %v696_v41 = vpop.f32.mrb[17].mxu0 }
 0x117   :  { %582 = vst [vmem:[#allocation2 + $0x38] sm:$0xff] %v566_v39  ;;  %v697_v42 = vadd.f32 %v696_v41, %v695_v40  ;;  %v698_v43 = vpop.f32.mrb[18].mxu0 }
 0x118   :  { %v699_v44 = vpop.f32.mrb[19].mxu0 }
 0x119   :  { %v700_v45 = vadd.f32 %v699_v44, %v698_v43  ;;  %v529_v46 = vadd.f32 %v697_v42, %v528_v18 }
 0x11b   :  { %v567_v47 = vmax.f32 %v529_v46, 0.0  ;;  %v532_v48 = vadd.f32 %v700_v45, %v531_v22 }
 0x11d   :  { %583 = vst [vmem:[#allocation2 + $0x40] sm:$0xff] %v567_v47  ;;  %v568_v49 = vmax.f32 %v532_v48, 0.0  ;;  %v701_v50 = vpop.f32.mrb[20].mxu0 }
 0x11e   :  { %v702_v51 = vpop.f32.mrb[21].mxu0 }
 0x11f   :  { %584 = vst [vmem:[#allocation2 + $0x48] sm:$0xff] %v568_v49  ;;  %v703_v52 = vadd.f32 %v702_v51, %v701_v50  ;;  %v704_v53 = vpop.f32.mrb[22].mxu0 }
 0x120   :  { %v705_v54 = vpop.f32.mrb[23].mxu0 }
 0x121   :  { %v537_v55 = vadd.f32 %v761_v16, %v703_v52  ;;  %v706_v56 = vadd.f32 %v705_v54, %v704_v53 }
 0x123   :  { %v569_v57 = vmax.f32 %v537_v55, 0.0  ;;  %v540_v58 = vadd.f32 %v762_v21, %v706_v56 }
 0x125   :  { %585 = vst [vmem:[#allocation2 + $0x50] sm:$0xff] %v569_v57  ;;  %v570_v59 = vmax.f32 %v540_v58, 0.0  ;;  %v707_v60 = vpop.f32.mrb[24].mxu0 }
 0x126   :  { %v708_v61 = vpop.f32.mrb[25].mxu0 }
 0x127   :  { %586 = vst [vmem:[#allocation2 + $0x58] sm:$0xff] %v570_v59  ;;  %v709_v62 = vadd.f32 %v708_v61, %v707_v60  ;;  %v710_v63 = vpop.f32.mrb[26].mxu0 }
 0x128   :  { %v711_v0 = vpop.f32.mrb[27].mxu0 }
 0x129   :  { %v712_v1 = vadd.f32 %v711_v0, %v710_v63  ;;  %v545_v2 = vadd.f32 %v709_v62, %v544_v32 }
 0x12b   :  { %v571_v3 = vmax.f32 %v545_v2, 0.0  ;;  %v548_v4 = vadd.f32 %v712_v1, %v547_v36 }
 0x12d   :  { %587 = vst [vmem:[#allocation2 + $0x60] sm:$0xff] %v571_v3  ;;  %v572_v5 = vmax.f32 %v548_v4, 0.0  ;;  %v713_v6 = vpop.f32.mrb[28].mxu0 }
 0x12e   :  { %v714_v7 = vpop.f32.mrb[29].mxu0 }
 0x12f   :  { %588 = vst [vmem:[#allocation2 + $0x68] sm:$0xff] %v572_v5  ;;  %v715_v8 = vadd.f32 %v714_v7, %v713_v6  ;;  %v716_v9 = vpop.f32.mrb[30].mxu0 }
 0x130   :  { %v717_v10 = vpop.f32.mrb[31].mxu0 }
 0x131   :  { %v553_v11 = vadd.f32 %v765_v30, %v715_v8  ;;  %v718_v12 = vadd.f32 %v717_v10, %v716_v9 }
 0x133   :  { %v573_v13 = vmax.f32 %v553_v11, 0.0  ;;  %v556_v14 = vadd.f32 %v766_v35, %v718_v12 }
 0x135   :  { %589 = vst [vmem:[#allocation2 + $0x70] sm:$0xff] %v573_v13  ;;  %v574_v15 = vmax.f32 %v556_v14, 0.0 }
 0x137   :  { %590 = vst [vmem:[#allocation2 + $0x78] sm:$0xff] %v574_v15 }
 0x138   :  { %837 = shalt.err (!%p834_p4)
}
 0x139   :  { %s838_s23 = scalar_lea.hbm %s1026_s2, 2048 }
 0x13a   :  { %p839_p5 = scmp.ne.s32.totalorder %s1026_s2, %s838_s23  ;;  %p842_p6 = scmp.lt.u32.totalorder %s838_s23, %s1026_s2 }
 0x13c   :  { %p844_p7 = pnand %p842_p6, %p839_p5 }
 0x13e   :  { %847 = shalt.err (!%p844_p7)
}
 0x13f   :  { %s851_s28 = smov 128   ;;  %s852_s29 = smov 8  }
 0x140   :  { %602 = dma.vmem_to_hbm [thread:$0]  %s597_s19, 2048, %s1026_s2, [#allocation3], %s851_s28, %s851_s28, %s852_s29  }
 0x141   :  { %848 = dma.done.wait [#allocation3], 2048  }
 0x142   :  { %849 = vsyncadd [#allocation3], 4294965248 }
 0x143   :  { %606 = vsyncpa [#allocation3], 1 }

</bundles_post_ra>
